<compile_context>
chip_gen: v7x
topology: tpu7x:2x2x1
jax: 0.10.0
libtpu: 0.0.40
codegen_flags: <defaults>
</compile_context>

<pallas_src>
import functools

import jax
import jax.numpy as jnp
from jax import lax
from jax.experimental import pallas as pl
from jax.experimental.pallas import tpu as pltpu

DROPOUT_P = 0.3
_KEEP_SCALE = 1.0 / (1.0 - DROPOUT_P)
_DROP_THRESHOLD = int(round(DROPOUT_P * (1 << 32)))  # drop iff bits < p * 2^32


# ---------------------------------------------------------------------------
# Dropout mask helpers
# ---------------------------------------------------------------------------
def _keep_mask(seed, row0, shape, use_hw_prng):
    """Per-element keep mask for inverted dropout (True = keep)."""
    if use_hw_prng:
        # Hardware PRNG: one draw per vreg instead of ~10 uint32 VPU ops/elem.
        pltpu.prng_seed(seed + row0)                      # distinct stream / row tile
        bits = pltpu.bitcast(pltpu.prng_random_bits(shape), jnp.uint32)
        return bits >= jnp.uint32(_DROP_THRESHOLD)
    # Interpreter / CPU fallback: stateless lowbias32 hash of (seed, row, col).
    rows = (lax.broadcasted_iota(jnp.int32, shape, 0) + row0).astype(jnp.uint32)
    cols = lax.broadcasted_iota(jnp.int32, shape, 1).astype(jnp.uint32)
    h = seed.astype(jnp.uint32)
    h = h + rows * jnp.uint32(0x9E3779B1) + cols * jnp.uint32(0x85EBCA77)
    h = h ^ (h >> 16)
    h = h * jnp.uint32(0x7FEB352D)
    h = h ^ (h >> 15)
    h = h * jnp.uint32(0x846CA68B)
    h = h ^ (h >> 16)
    return h >= jnp.uint32(_DROP_THRESHOLD)


# ---------------------------------------------------------------------------
# Kernels
# ---------------------------------------------------------------------------
def _ffwd_kernel_resident(seed_ref, x_ref, w1_ref, b1_ref, w2_ref, b2_ref, o_ref,
                          *, training: bool, tm: int, use_hw_prng: bool):
    """Weights-resident path: 1-D grid over row tiles, no reduction axis."""
    row0 = pl.program_id(0) * tm
    h = jnp.dot(x_ref[...], w1_ref[...],
                preferred_element_type=jnp.float32) + b1_ref[...]
    h = jnp.maximum(h, 0.0)
    y = jnp.dot(h.astype(w2_ref.dtype), w2_ref[...],
                preferred_element_type=jnp.float32) + b2_ref[...]
    if training:
        keep = _keep_mask(seed_ref[0], row0, y.shape, use_hw_prng)
        y = jnp.where(keep, y * _KEEP_SCALE, 0.0)
    o_ref[...] = y.astype(o_ref.dtype)


def _ffwd_kernel_tiled(seed_ref, x_ref, w1_ref, b1_ref, w2_ref, b2_ref, o_ref,
                       acc_ref, *, training: bool, tm: int, use_hw_prng: bool):
    """Hidden-tiled path: grid = (rows, hidden); hidden is a reduction."""
    j = pl.program_id(1)
    # Computed at the TOP LEVEL of the kernel (not inside pl.when) so the
    # interpreter substitutes it; the epilogue closure just captures the value.
    row0 = pl.program_id(0) * tm

    # First matmul + bias + ReLU for this hidden tile (bf16 operands, f32 acc).
    h = jnp.dot(x_ref[...], w1_ref[...],
                preferred_element_type=jnp.float32) + b1_ref[...]
    h = jnp.maximum(h, 0.0)
    partial = jnp.dot(h.astype(w2_ref.dtype), w2_ref[...],
                      preferred_element_type=jnp.float32)

    @pl.when(j == 0)
    def _():
        # Write the first partial directly: saves a full (tm, C) f32 VMEM
        # write+read pass vs. zero-init followed by '+='.
        acc_ref[...] = partial

    @pl.when(j > 0)
    def _():
        acc_ref[...] += partial

    @pl.when(j == pl.num_programs(1) - 1)
    def _():
        y = acc_ref[...] + b2_ref[...]
        if training:
            keep = _keep_mask(seed_ref[0], row0, y.shape, use_hw_prng)
            y = jnp.where(keep, y * _KEEP_SCALE, 0.0)
        o_ref[...] = y.astype(o_ref.dtype)


# ---------------------------------------------------------------------------
# Host-side wrapper
# ---------------------------------------------------------------------------
def _vmem_limit_bytes():
    """~75% of physical VMEM (96 MiB on v5e/v6e, 48 MiB on v7x); safe fallback."""
    try:
        cap = int(pltpu.get_tpu_info().vmem_capacity_bytes)
    except Exception:  # not on a TPU / old API: conservative default
        cap = 64 * 1024 * 1024
    return max(32 * 1024 * 1024, int(cap * 0.75))


def _choose_tiles(M, H, C, isz, vmem_limit, tm, th):
    """Pick row/hidden tiles; decide whether both weight matrices stay resident."""
    weight_bytes = 2 * C * H * isz + (H + C) * 4
    resident = weight_bytes <= min(vmem_limit // 3, 24 * 1024 * 1024)

    if tm is None:
        # Large row tiles meet the per-generation MXU intensity targets
        # (~670 FLOP/B on v6e, ~311 on v7x) and amortize per-step overhead.
        for cand in (1024, 768, 512, 384, 256, 128, 64, 32, 16, 8):
            if cand <= M and M % cand == 0:
                tm = cand
                break
        else:
            tm = M
    tm = min(tm, M)

    if th is None:
        if resident:
            th = H
        else:
            for cand in (2048, 1024, 512, 256, 128):
                if cand <= H and H % cand == 0:
                    th = cand
                    break
            else:
                th = H
    th = min(th, H)
    resident = resident and (th == H)

    def usage(tm_):
        x_buf = 2 * tm_ * C * isz          # double-buffered x tile
        o_buf = 2 * tm_ * C * 4            # double-buffered output tile (<= f32)
        h_stage = tm_ * th * 4             # f32 hidden staging
        if resident:
            w_buf = 2 * C * H * isz + (H + C) * 4
            acc = 0
        else:
            w_buf = 2 * (2 * C * th * isz) + 2 * (th + C) * 4
            acc = tm_ * C * 4
        return x_buf + o_buf + h_stage + w_buf + acc

    while tm > 8 and usage(tm) > vmem_limit and M % (tm // 2) == 0:
        tm //= 2
    return tm, th, resident


def feed_forward(x, w1, b1, w2, b2, *, seed=0, training=True,
                 tm=None, th=None, compute_dtype=jnp.bfloat16):
    """x: (B, T, C). w1: (C, 4C), b1: (4C,), w2: (4C, C), b2: (C,)."""
    B, T, C = x.shape
    H = w1.shape[1]
    M = B * T
    isz = jnp.dtype(compute_dtype).itemsize

    vmem_limit = _vmem_limit_bytes()
    tm, th, resident = _choose_tiles(M, H, C, isz, vmem_limit, tm, th)
    assert M % tm == 0, f"row tile {tm} does not divide M={M}"
    assert H % th == 0, f"hidden tile {th} does not divide H={H}"
    assert th % 128 == 0 or th == H, "hidden tile must be lane-aligned"

    use_hw_prng = jax.default_backend() == "tpu"

    x2d = x.reshape(M, C).astype(compute_dtype)
    w1c = w1.astype(compute_dtype)
    w2c = w2.astype(compute_dtype)
    b1_2d = b1.reshape(1, H).astype(jnp.float32)
    b2_2d = b2.reshape(1, C).astype(jnp.float32)
    seed_arr = jnp.array([seed], dtype=jnp.int32)

    # HBM traffic: weights are fetched once on the resident path, once per row
    # tile otherwise (the review's correction to the previous estimate).
    w_traffic = (1 if resident else (M // tm)) * 2 * C * H * isz
    cost = pl.CostEstimate(
        flops=4 * M * C * H,                 # two matmuls, 2 flops/MAC
        transcendentals=0,
        bytes_accessed=(M * C * isz + w_traffic + (H + C) * 4
                        + M * C * jnp.dtype(x.dtype).itemsize))

    compiler_params = pltpu.CompilerParams(
        dimension_semantics=("parallel",) if resident else ("parallel", "arbitrary"),
        vmem_limit_bytes=vmem_limit)

    if resident:
        kernel = functools.partial(_ffwd_kernel_resident, training=training,
                                   tm=tm, use_hw_prng=use_hw_prng)
        grid_spec = pltpu.PrefetchScalarGridSpec(
            num_scalar_prefetch=1,
            grid=(M // tm,),
            in_specs=[
                pl.BlockSpec((tm, C), lambda i, s: (i, 0)),   # x row tile
                pl.BlockSpec((C, H),  lambda i, s: (0, 0)),   # W1 (resident)
                pl.BlockSpec((1, H),  lambda i, s: (0, 0)),   # b1
                pl.BlockSpec((H, C),  lambda i, s: (0, 0)),   # W2 (resident)
                pl.BlockSpec((1, C),  lambda i, s: (0, 0)),   # b2
            ],
            out_specs=pl.BlockSpec((tm, C), lambda i, s: (i, 0)),
            scratch_shapes=[],
        )
    else:
        kernel = functools.partial(_ffwd_kernel_tiled, training=training,
                                   tm=tm, use_hw_prng=use_hw_prng)
        grid_spec = pltpu.PrefetchScalarGridSpec(
            num_scalar_prefetch=1,
            grid=(M // tm, H // th),
            in_specs=[
                pl.BlockSpec((tm, C), lambda i, j, s: (i, 0)),   # x row tile
                pl.BlockSpec((C, th), lambda i, j, s: (0, j)),   # W1 col tile
                pl.BlockSpec((1, th), lambda i, j, s: (0, j)),   # b1 tile
                pl.BlockSpec((th, C), lambda i, j, s: (j, 0)),   # W2 row tile
                pl.BlockSpec((1, C),  lambda i, j, s: (0, 0)),   # b2
            ],
            out_specs=pl.BlockSpec((tm, C), lambda i, j, s: (i, 0)),
            scratch_shapes=[pltpu.VMEM((tm, C), jnp.float32)],
        )

    out2d = pl.pallas_call(
        kernel,
        out_shape=jax.ShapeDtypeStruct((M, C), x.dtype),
        grid_spec=grid_spec,
        compiler_params=compiler_params,
        cost_estimate=cost,
    )(seed_arr, x2d, w1c, b1_2d, w2c, b2_2d)

    return out2d.reshape(B, T, C)


def init_params(key, n_embd):
    """Deterministic init mimicking torch.nn.Linear default (U[-1/sqrt(fan_in), +])."""
    h = 4 * n_embd
    k1, k2, k3, k4 = jax.random.split(key, 4)
    lim1 = 1.0 / (n_embd ** 0.5)
    lim2 = 1.0 / (h ** 0.5)
    # Stored as (in, out) so the kernel does x @ W directly.
    w1 = jax.random.uniform(k1, (n_embd, h), jnp.float32, -lim1, lim1)
    b1 = jax.random.uniform(k2, (h,), jnp.float32, -lim1, lim1)
    w2 = jax.random.uniform(k3, (h, n_embd), jnp.float32, -lim2, lim2)
    b2 = jax.random.uniform(k4, (n_embd,), jnp.float32, -lim2, lim2)
    return w1, b1, w2, b2


if __name__ == "__main__":
    key = jax.random.PRNGKey(0)
    n_embd = 32
    B, T = 2, 8

    kx, kp = jax.random.split(key)
    x = jax.random.normal(kx, (B, T, n_embd), jnp.float32)
    w1, b1, w2, b2 = init_params(kp, n_embd)

    # Eval mode (dropout off): check numerics against a pure-JAX bf16 reference.
    y_eval = feed_forward(x, w1, b1, w2, b2, training=False)
    xb = x.reshape(-1, n_embd).astype(jnp.bfloat16)
    h_ref = jnp.maximum(
        jnp.dot(xb, w1.astype(jnp.bfloat16),
                preferred_element_type=jnp.float32) + b1, 0.0)
    y_ref = (jnp.dot(h_ref.astype(jnp.bfloat16), w2.astype(jnp.bfloat16),
                     preferred_element_type=jnp.float32) + b2).reshape(B, T, n_embd)
    assert jnp.allclose(y_eval, y_ref, atol=2e-2, rtol=2e-2), \
        "eval-mode mismatch vs reference"

    # Training mode: in-kernel inverted dropout with p = 0.3.
    y_train = feed_forward(x, w1, b1, w2, b2, seed=1234, training=True)
    jax.block_until_ready(y_train)
    assert y_train.shape == (B, T, n_embd)
    dropped = float(jnp.mean((y_train == 0).astype(jnp.float32)))
    assert 0.05 < dropped < 0.6, f"dropout fraction looks wrong: {dropped}"

    print("KERNEL_OK")
</pallas_src>

<mosaic_0001>
module attributes {stable_mosaic.version = 11 : i64} {
  func.func @_ffwd_kernel_resident(%arg0: i32, %arg1: memref<1xi32, #tpu.memory_space<smem>>, %arg2: memref<16x32xbf16, #tpu.memory_space<vmem>>, %arg3: memref<32x128xbf16, #tpu.memory_space<vmem>>, %arg4: memref<1x128xf32, #tpu.memory_space<vmem>>, %arg5: memref<128x32xbf16, #tpu.memory_space<vmem>>, %arg6: memref<1x32xf32, #tpu.memory_space<vmem>>, %arg7: memref<16x32xf32, #tpu.memory_space<vmem>>) attributes {dimension_semantics = [#tpu.dimension_semantics<parallel>], iteration_bounds = array<i64: 1>, scalar_prefetch = 1 : i64, scratch_operands = 0 : i64, tpu.core_type = #tpu.core_type<tc>, window_params = [{transform_indices = @transform_0, window_bounds = array<i64: 16, 32>}, {pipeline_mode = #tpu.pipeline_mode<synchronous>, transform_indices = @transform_1, window_bounds = array<i64: 32, 128>}, {pipeline_mode = #tpu.pipeline_mode<synchronous>, transform_indices = @transform_2, window_bounds = array<i64: 1, 128>}, {pipeline_mode = #tpu.pipeline_mode<synchronous>, transform_indices = @transform_3, window_bounds = array<i64: 128, 32>}, {pipeline_mode = #tpu.pipeline_mode<synchronous>, transform_indices = @transform_4, window_bounds = array<i64: 1, 32>}, {transform_indices = @transform_5, window_bounds = array<i64: 16, 32>}]} {
    %c0 = arith.constant 0 : index
    %c0_0 = arith.constant 0 : index
    %0 = vector.load %arg2[%c0, %c0_0] : memref<16x32xbf16, #tpu.memory_space<vmem>>, vector<16x32xbf16>
    %c0_1 = arith.constant 0 : index
    %c0_2 = arith.constant 0 : index
    %1 = vector.load %arg3[%c0_1, %c0_2] : memref<32x128xbf16, #tpu.memory_space<vmem>>, vector<32x128xbf16>
    %cst = arith.constant dense<0.000000e+00> : vector<16x128xf32>
    %2 = tpu.matmul %0, %1, %cst {dimension_numbers = #tpu.dot_dimension_numbers<[1], [0], [0], [1], [0, 0, 1, 1], [], []>} : vector<16x32xbf16>, vector<32x128xbf16>, vector<16x128xf32> -> vector<16x128xf32>
    %c0_3 = arith.constant 0 : index
    %c0_4 = arith.constant 0 : index
    %3 = vector.load %arg4[%c0_3, %c0_4] : memref<1x128xf32, #tpu.memory_space<vmem>>, vector<1x128xf32>
    %4 = vector.broadcast %3 : vector<1x128xf32> to vector<16x128xf32>
    %5 = arith.addf %2, %4 : vector<16x128xf32>
    %cst_5 = arith.constant 0.000000e+00 : f32
    %6 = vector.broadcast %cst_5 : f32 to vector<16x128xf32>
    %7 = arith.maximumf %5, %6 : vector<16x128xf32>
    %8 = arith.truncf %7 : vector<16x128xf32> to vector<16x128xbf16>
    %c0_6 = arith.constant 0 : index
    %c0_7 = arith.constant 0 : index
    %9 = vector.load %arg5[%c0_6, %c0_7] : memref<128x32xbf16, #tpu.memory_space<vmem>>, vector<128x32xbf16>
    %cst_8 = arith.constant dense<0.000000e+00> : vector<16x32xf32>
    %10 = tpu.matmul %8, %9, %cst_8 {dimension_numbers = #tpu.dot_dimension_numbers<[1], [0], [0], [1], [0, 0, 1, 1], [], []>} : vector<16x128xbf16>, vector<128x32xbf16>, vector<16x32xf32> -> vector<16x32xf32>
    %c0_9 = arith.constant 0 : index
    %c0_10 = arith.constant 0 : index
    %11 = vector.load %arg6[%c0_9, %c0_10] : memref<1x32xf32, #tpu.memory_space<vmem>>, vector<1x32xf32>
    %12 = vector.broadcast %11 : vector<1x32xf32> to vector<16x32xf32>
    %13 = arith.addf %10, %12 : vector<16x32xf32>
    %c0_11 = arith.constant 0 : index
    %c0_12 = arith.constant 0 : index
    %14 = vector.load %arg7[%c0_11, %c0_12] : memref<16x32xf32, #tpu.memory_space<vmem>>, vector<16x32xf32>
    tpu.vector_store %arg7[%c0_11, %c0_12], %13 {strides = array<i32>} : memref<16x32xf32, #tpu.memory_space<vmem>>, vector<16x32xf32>,
    return
  }
  func.func @transform_0(%arg0: i32, %arg1: memref<1xi32, #tpu.memory_space<smem>>) -> (i32, i32) {
    %c0_i32 = arith.constant 0 : i32
    %c0_i32_0 = arith.constant 0 : i32
    return %arg0, %c0_i32 : i32, i32
  }
  func.func @transform_1(%arg0: i32, %arg1: memref<1xi32, #tpu.memory_space<smem>>) -> (i32, i32) {
    %c0_i32 = arith.constant 0 : i32
    %c0_i32_0 = arith.constant 0 : i32
    %c0_i32_1 = arith.constant 0 : i32
    return %c0_i32, %c0_i32_0 : i32, i32
  }
  func.func @transform_2(%arg0: i32, %arg1: memref<1xi32, #tpu.memory_space<smem>>) -> (i32, i32) {
    %c0_i32 = arith.constant 0 : i32
    %c0_i32_0 = arith.constant 0 : i32
    %c0_i32_1 = arith.constant 0 : i32
    return %c0_i32, %c0_i32_0 : i32, i32
  }
  func.func @transform_3(%arg0: i32, %arg1: memref<1xi32, #tpu.memory_space<smem>>) -> (i32, i32) {
    %c0_i32 = arith.constant 0 : i32
    %c0_i32_0 = arith.constant 0 : i32
    %c0_i32_1 = arith.constant 0 : i32
    return %c0_i32, %c0_i32_0 : i32, i32
  }
  func.func @transform_4(%arg0: i32, %arg1: memref<1xi32, #tpu.memory_space<smem>>) -> (i32, i32) {
    %c0_i32 = arith.constant 0 : i32
    %c0_i32_0 = arith.constant 0 : i32
    %c0_i32_1 = arith.constant 0 : i32
    return %c0_i32, %c0_i32_0 : i32, i32
  }
  func.func @transform_5(%arg0: i32, %arg1: memref<1xi32, #tpu.memory_space<smem>>) -> (i32, i32) {
    %c0_i32 = arith.constant 0 : i32
    %c0_i32_0 = arith.constant 0 : i32
    return %arg0, %c0_i32 : i32, i32
  }
}

</mosaic_0001>

<bundles_post_ra>
// kernel: tpu_custom_call.1
= control target key start
LH: loop header
LB: loop body
LE: loop exit
PB: predicated region body
PF: predicated region fallthrough
CT: control target
= control target key end

     0   :  { %v326_v1 = vmov 0.0   ;;  %vm327_vm0 = vmmov 0   ;;  %vm54_vm1 = vcmask 261120   ;;  %s420_s0 = inlined_call_operand.<no memory space> [shape: s32[1], index: 0, kind: input, shape index: {}]   ;;  %s421_s1 = inlined_call_operand.vmem [shape: bf16[16,32], index: 1, kind: input, shape index: {}]   ;;  %s422_s2 = inlined_call_operand.vmem [shape: bf16[32,128], index: 2, kind: input, shape index: {}]   ;;  %s423_s3 = inlined_call_operand.vmem [shape: f32[1,128], index: 3, kind: input, shape index: {}]   ;;  %s424_s4 = inlined_call_operand.vmem [shape: bf16[128,32], index: 4, kind: input, shape index: {}]   ;;  %s425_s5 = inlined_call_operand.vmem [shape: f32[1,32], index: 5, kind: input, shape index: {}]   ;;  %s426_s6 = inlined_call_operand.hbm [shape: f32[16,32], index: 6, kind: output, shape index: {}]  }
   0x1   :  { %v291_v0 = vld [vmem:[%s422_s2] sm:$0xff]   ;;  %258 = vmatprep.subr.bf16.mxu0 %v326_v1  ;;  %266 = vmatprep.subr.bf16.mxu1 %v326_v1  ;;  %v292_v2 = vld [vmem:[%s422_s2 + $0x8] sm:$0xff]   ;;  %v296_v6 = vld [vmem:[%s424_s4 + $0x10] sm:$0xff]  }
   0x2   :  { %259 = vmatpush3.bf16.msra.mxu0 %v291_v0  ;;  %262 = vmatprep.mubr.msk.bf16.mxu0 %vm327_vm0, %v326_v1  ;;  %v294_v3 = vld [vmem:[%s424_s4] sm:$0xff]   ;;  %v295_v5 = vld [vmem:[%s424_s4 + $0x8] sm:$0xff]  }
   0x3   :  { %260 = vmatprep.subr.bf16.mxu0 %v326_v1  ;;  %282 = vmatprep.mubr.msk.bf16.mxu1 %vm327_vm0, %v326_v1  ;;  %v293_v4 = vld [vmem:[%s421_s1] sm:$0xff]  }
   0x4   :  { %267 = vmatpush3.bf16.msra.mxu1 %v294_v3 }
   0x5   :  { %268 = vmatprep.subr.bf16.mxu1 %v326_v1 }
   0x6   :  { %261 = vmatpush3.bf16.msra.mxu0 %v292_v2 }
   0x8   :  { %269 = vmatpush3.bf16.msra.mxu1 %v295_v5 }
   0x9   :  { %263 = vmatmul.mubr.msk.bf16.vlgmr.msra.gmra.mrb[0].mxu0 %vm54_vm1, %v293_v4  ;;  %270 = vmatprep.subr.bf16.mxu1 %v326_v1 }
   0xa   :  { %12 = vsyncpa [#allocation5], 0  ;;  %v297_v7 = vld [vmem:[%s424_s4 + $0x18] sm:$0xff]   ;;  %v298_v8 = vld [vmem:[%s424_s4 + $0x20] sm:$0xff]  }
   0xb   :  { %v299_v9 = vld [vmem:[%s424_s4 + $0x28] sm:$0xff]   ;;  %v300_v10 = vld [vmem:[%s424_s4 + $0x30] sm:$0xff]   ;;  %v301_v11 = vld [vmem:[%s424_s4 + $0x38] sm:$0xff]   ;;  %s328_s4 = smov [#allocation4]  }
   0xc   :  { %271 = vmatpush3.bf16.msra.mxu1 %v296_v6  ;;  %v232_v12 = vld [vmem:[%s423_s3] ss:$0 sm:$0xff]  ;;  %s221_s20 = sshll.u32 %s328_s4, 4  ;;  %s222_s20 = int_to_ptr.vmem [resolvable:$true] %s221_s20 }
   0xd   :  { %272 = vmatprep.subr.bf16.mxu1 %v326_v1  ;;  %v237_v22 = vld [vmem:[%s425_s5] ss:$0 sm:$0xff]  ;;  %s302_s3 = scalar_lea.vmem %s222_s20, 256  ;;  %p307_p1 = scmp.lt.s32.totalorder %s222_s20, %s222_s20 }
   0xe   :  { %p303_p0 = scmp.ne.s32.totalorder %s222_s20, %s302_s3  ;;  %p308_p2 = scmp.lt.s32.totalorder %s302_s3, %s302_s3 }
  0x10   :  { %273 = vmatpush3.bf16.msra.mxu1 %v297_v7  ;;  %p309_p3 = por %p308_p2, %p307_p1 }
  0x11   :  { %274 = vmatprep.subr.bf16.mxu1 %v326_v1 }
  0x12   :  { %p310_p4 = pnand %p309_p3, %p303_p0 }
  0x14   :  { %275 = vmatpush3.bf16.msra.mxu1 %v298_v8 }
  0x15   :  { %276 = vmatprep.subr.bf16.mxu1 %v326_v1 }
  0x18   :  { %277 = vmatpush3.bf16.msra.mxu1 %v299_v9 }
  0x19   :  { %278 = vmatprep.subr.bf16.mxu1 %v326_v1 }
  0x1c   :  { %279 = vmatpush3.bf16.msra.mxu1 %v300_v10 }
  0x1d   :  { %280 = vmatprep.subr.bf16.mxu1 %v326_v1 }
  0x20   :  { %281 = vmatpush3.bf16.msra.mxu1 %v301_v11 }
  0xdc   :  { %v92_v13 = vpop.f32.mrb[0].mxu0 }
  0xdd   :  { %v93_v14 = vadd.f32 %v232_v12, %v92_v13  ;;  %v264_v15 = vpop.f32.mrb[1].mxu0 }
  0xde   :  { %v95_v16 = vpop.f32.mrb[2].mxu0 }
  0xdf   :  { %v96_v17 = vadd.f32 %v232_v12, %v95_v16  ;;  %v265_v18 = vpop.f32.mrb[3].mxu0  ;;  %v99_v19 = vmax.f32 %v93_v14, 0.0 }
  0xe1   :  { %v100_v20 = vmax.f32 %v96_v17, 0.0 }
  0xe3   :  { %v101_v21 = vpack.c.bf16 %v100_v20, %v99_v19 }
  0xe5   :  { %283 = vmatmul.mubr.bf16.vlgmr.msra.gmra.mrb[0].mxu1 %v101_v21 }
 0x1b8   :  { %v207_v23 = vpop.f32.mrb[0].mxu1 }
 0x1b9   :  { %v208_v24 = vadd.f32 %v237_v22, %v207_v23  ;;  %v284_v25 = vpop.f32.mrb[1].mxu1 }
 0x1ba   :  { %v210_v26 = vpop.f32.mrb[2].mxu1 }
 0x1bb   :  { %214 = vst.msk [vmem:[#allocation4] sm:$0xff] %vm54_vm1, %v208_v24  ;;  %v211_v27 = vadd.f32 %v237_v22, %v210_v26  ;;  %v285_v28 = vpop.f32.mrb[3].mxu1 }
 0x1bd   :  { %215 = vst.msk [vmem:[#allocation4 + $0x8] sm:$0xff] %vm54_vm1, %v211_v27 }
 0x1be   :  { %313 = shalt.err (!%p310_p4)
}
 0x1bf   :  { %s314_s0 = scalar_lea.hbm %s426_s6, 256 }
 0x1c0   :  { %p315_p5 = scmp.ne.s32.totalorder %s426_s6, %s314_s0  ;;  %p318_p6 = scmp.lt.u32.totalorder %s314_s0, %s426_s6 }
 0x1c2   :  { %p320_p7 = pnand %p318_p6, %p315_p5 }
 0x1c4   :  { %323 = shalt.err (!%p320_p7)
}
 0x1c5   :  { %s329_s26 = smov 128   ;;  %s330_s27 = smov 8  }
 0x1c6   :  { %227 = dma.vmem_to_hbm [thread:$0]  %s222_s20, 256, %s426_s6, [#allocation5], %s329_s26, %s329_s26, %s330_s27  }
 0x1c7   :  { %324 = dma.done.wait [#allocation5], 256  }
 0x1c8   :  { %325 = vsyncadd [#allocation5], 4294967040 }
 0x1c9   :  { %231 = vsyncpa [#allocation5], 1 }

</bundles_post_ra>
